<compile_context>
chip_gen: v7x
topology: tpu7x:2x2x1
jax: 0.10.0
libtpu: 0.0.40
codegen_flags: <defaults>
</compile_context>

<pallas_src>
import functools

import jax
import jax.numpy as jnp
from jax import lax
from jax.experimental import pallas as pl
from jax.experimental.pallas import tpu as pltpu

EPS = 1e-5
_LANE = 128


def _round_up(x, m):
    return ((x + m - 1) // m) * m


def _pick_hw_tile(hw, cin, itemsize, target_bytes=2 << 20, max_lanes=32768):
    """Spatial tile (multiple of 128 lanes) moving ~target_bytes of X per step."""
    hw128 = _round_up(hw, _LANE)
    lanes = max(_LANE, min(max_lanes, target_bytes // max(cin * itemsize, 1)))
    lanes = (lanes // _LANE) * _LANE
    if hw128 <= lanes:
        return hw128, hw128
    num_t = -(-hw128 // lanes)
    tile = _round_up(-(-hw128 // num_t), _LANE)
    return tile, tile * num_t


def _vmem_limit(bytes_needed):
    """Explicit scoped-VMEM request with headroom, safe on v5e/v6e/v7x."""
    return int(min(max(2 * bytes_needed + (4 << 20), 24 << 20), 40 << 20))


# --------------------------- fast path (single kernel) -----------------------
def _fused_small_kernel(x_ref, w_ref, gamma_ref, beta_ref, o_ref, z_scr, *, inv_m):
    # x_ref: (N, Cin, HWp); w_ref: (Cout, Cin); gamma/beta: (Cout, 1) f32
    # o_ref: (N, Cout, HWp); z_scr: (N, Cout, HWp) f32 -- Z stays resident in VMEM
    n = x_ref.shape[0]
    cout = w_ref.shape[0]
    sum_z = jnp.zeros((cout, 1), jnp.float32)
    sum_zz = jnp.zeros((cout, 1), jnp.float32)
    for i in range(n):                       # static unroll (fast path only: small N)
        z = jnp.dot(w_ref[...], x_ref[i], preferred_element_type=jnp.float32)
        z_scr[i] = z
        sum_z = sum_z + jnp.sum(z, axis=1, keepdims=True)
        sum_zz = sum_zz + jnp.sum(z * z, axis=1, keepdims=True)
    mean = sum_z * inv_m
    var = jnp.maximum(sum_zz * inv_m - mean * mean, 0.0)
    scale = gamma_ref[...] * lax.rsqrt(var + EPS)
    shift = beta_ref[...] - mean * scale
    for i in range(n):
        o_ref[i] = jnp.maximum(scale * z_scr[i] + shift, 0.0).astype(o_ref.dtype)


# --------------------------- pass 1: gram statistics of X --------------------
def _gram_kernel(x_ref, sumx_ref, gram_ref, acc_sx, acc_g):
    # x_ref: (Cin, T) one spatial tile of one batch element
    # outputs (per n, written on the last tile): sum_x (Cin,1), X@X^T (Cin,Cin)
    t = pl.program_id(1)

    @pl.when(t == 0)
    def _():
        acc_sx[...] = jnp.zeros_like(acc_sx)
        acc_g[...] = jnp.zeros_like(acc_g)

    x = x_ref[...].astype(jnp.float32)
    acc_sx[...] += jnp.sum(x, axis=1, keepdims=True)
    acc_g[...] += lax.dot_general(x, x, (((1,), (1,)), ((), ())),
                                  preferred_element_type=jnp.float32)

    @pl.when(t == pl.num_programs(1) - 1)
    def _():
        sumx_ref[...] = acc_sx[...]
        gram_ref[...] = acc_g[...]


# --------------------------- pass 2: normalize + affine + ReLU ---------------
def _apply_kernel(x_ref, weff_ref, shift_ref, o_ref):
    z = jnp.dot(weff_ref[...], x_ref[...], preferred_element_type=jnp.float32)
    o_ref[...] = jnp.maximum(z + shift_ref[...], 0.0).astype(o_ref.dtype)


def block1_forward(x_nchw, w_conv, b_conv, gamma, beta, *,
                   compute_dtype=None, out_dtype=None, force_two_pass=False):
    """x_nchw: (N, Cin, H, W); w_conv: (Cout, Cin, 1, 1).  Returns (N, Cout, H, W).

    b_conv is accepted for API fidelity but cancels exactly under training-mode
    BatchNorm.  compute_dtype controls the HBM->MXU dtype of X/W (bf16 halves
    the dominant HBM traffic; accumulation stays f32); out_dtype controls the
    stored output dtype.  Defaults keep everything in the input dtype.
    """
    del b_conv
    N, Cin, H, W = x_nchw.shape
    Cout = w_conv.shape[0]
    HW = H * W
    M = N * HW
    inv_m = 1.0 / M

    compute_dtype = jnp.dtype(compute_dtype or x_nchw.dtype)
    out_dtype = jnp.dtype(out_dtype or x_nchw.dtype)
    cb = compute_dtype.itemsize
    ob = out_dtype.itemsize

    hw_tile, hw_pad = _pick_hw_tile(HW, Cin, cb)
    num_t = hw_pad // hw_tile

    x3d = x_nchw.reshape(N, Cin, HW).astype(compute_dtype)
    if hw_pad != HW:
        x3d = jnp.pad(x3d, ((0, 0), (0, 0), (0, hw_pad - HW)))
    w2d = w_conv.reshape(Cout, Cin).astype(jnp.float32)
    g2d = gamma.reshape(Cout, 1).astype(jnp.float32)
    be2d = beta.reshape(Cout, 1).astype(jnp.float32)

    # ---- Small-problem fast path: one fused kernel, X read from HBM once ----
    fast_bytes = (N * Cin * hw_pad * cb        # X resident in VMEM
                  + N * Cout * hw_pad * 4      # Z scratch (f32)
                  + N * Cout * hw_pad * ob)    # output
    if (not force_two_pass) and fast_bytes <= (6 << 20) and N <= 64:
        out3d = pl.pallas_call(
            functools.partial(_fused_small_kernel, inv_m=inv_m),
            out_shape=jax.ShapeDtypeStruct((N, Cout, hw_pad), out_dtype),
            scratch_shapes=[pltpu.VMEM((N, Cout, hw_pad), jnp.float32)],
            compiler_params=pltpu.CompilerParams(
                vmem_limit_bytes=_vmem_limit(fast_bytes)),
        )(x3d, w2d.astype(compute_dtype), g2d, be2d)
        return out3d[:, :, :HW].reshape(N, Cout, H, W)

    x_spec = pl.BlockSpec((None, Cin, hw_tile), lambda n, t: (n, 0, t))

    # ---- Pass 1: per-batch partial gram statistics (pure read-X reduction) --
    sumx_n, gram_n = pl.pallas_call(
        _gram_kernel,
        out_shape=(jax.ShapeDtypeStruct((N, Cin, 1), jnp.float32),
                   jax.ShapeDtypeStruct((N, Cin, Cin), jnp.float32)),
        grid_spec=pltpu.PrefetchScalarGridSpec(
            num_scalar_prefetch=0,
            grid=(N, num_t),
            in_specs=[x_spec],
            out_specs=(pl.BlockSpec((None, Cin, 1), lambda n, t: (n, 0, 0)),
                       pl.BlockSpec((None, Cin, Cin), lambda n, t: (n, 0, 0))),
            scratch_shapes=[pltpu.VMEM((Cin, 1), jnp.float32),
                            pltpu.VMEM((Cin, Cin), jnp.float32)]),
        compiler_params=pltpu.CompilerParams(
            dimension_semantics=("parallel", "arbitrary"),
            vmem_limit_bytes=_vmem_limit(2 * Cin * hw_tile * cb)),
        cost_estimate=pl.CostEstimate(
            flops=2 * N * hw_pad * Cin * Cin,
            transcendentals=0,
            bytes_accessed=N * Cin * hw_pad * cb + N * Cin * (Cin + 1) * 4),
    )(x3d)

    # ---- Tiny finalize (Cout x Cin work) in plain jnp ------------------------
    sum_x = jnp.sum(sumx_n, axis=0)                       # (Cin, 1)
    gram = jnp.sum(gram_n, axis=0)                        # (Cin, Cin)
    mean_x = sum_x * inv_m
    cov_x = gram * inv_m - mean_x @ mean_x.T              # E[xx^T] - mu mu^T
    mean_z = w2d @ mean_x                                 # (Cout, 1)
    var_z = jnp.maximum(
        jnp.sum((w2d @ cov_x) * w2d, axis=1, keepdims=True), 0.0)   # diag(W Cov W^T)
    scale = g2d * lax.rsqrt(var_z + EPS)
    shift = be2d - mean_z * scale
    w_eff = (scale * w2d).astype(compute_dtype)           # scale folded into W

    # ---- Pass 2: out = relu(w_eff @ x + shift), fully parallel grid ----------
    p2_bytes = 2 * hw_tile * (Cin * cb + Cout * ob)       # double-buffered in+out
    out3d = pl.pallas_call(
        _apply_kernel,
        out_shape=jax.ShapeDtypeStruct((N, Cout, hw_pad), out_dtype),
        grid_spec=pltpu.PrefetchScalarGridSpec(
            num_scalar_prefetch=0,
            grid=(N, num_t),
            in_specs=[x_spec,
                      pl.BlockSpec((Cout, Cin), lambda n, t: (0, 0)),
                      pl.BlockSpec((Cout, 1), lambda n, t: (0, 0))],
            out_specs=pl.BlockSpec((None, Cout, hw_tile), lambda n, t: (n, 0, t))),
        compiler_params=pltpu.CompilerParams(
            dimension_semantics=("parallel", "parallel"),
            vmem_limit_bytes=_vmem_limit(p2_bytes)),
        cost_estimate=pl.CostEstimate(
            flops=2 * N * hw_pad * Cin * Cout,
            transcendentals=0,
            bytes_accessed=N * hw_pad * (Cin * cb + Cout * ob)),
    )(x3d, w_eff, shift)

    return out3d[:, :, :HW].reshape(N, Cout, H, W)


def block1_reference(x_nchw, w_conv, b_conv, gamma, beta):
    """Plain-JAX reference mirroring PyTorch Conv2d(1x1)+BatchNorm2d(train)+ReLU."""
    N, Cin, H, W = x_nchw.shape
    Cout = w_conv.shape[0]
    x2d = jnp.transpose(x_nchw, (0, 2, 3, 1)).reshape(-1, Cin)
    y = x2d @ w_conv.reshape(Cout, Cin).T + b_conv[None, :]
    mean = jnp.mean(y, axis=0, keepdims=True)
    var = jnp.mean((y - mean) ** 2, axis=0, keepdims=True)
    y_hat = (y - mean) / jnp.sqrt(var + EPS)
    out = jnp.maximum(gamma[None, :] * y_hat + beta[None, :], 0.0)
    return jnp.transpose(out.reshape(N, H, W, Cout), (0, 3, 1, 2))


if __name__ == "__main__":
    key = jax.random.PRNGKey(0)
    k_x, k_w, k_b, k_g, k_be = jax.random.split(key, 5)

    N, Cin, H, W = 2, 4, 16, 16
    Cout = 8

    x = jax.random.normal(k_x, (N, Cin, H, W), dtype=jnp.float32)
    # Parameter shapes match nn.Conv2d / nn.BatchNorm2d.
    w_conv = jax.random.normal(k_w, (Cout, Cin, 1, 1), dtype=jnp.float32) * 0.1
    b_conv = jax.random.normal(k_b, (Cout,), dtype=jnp.float32) * 0.1
    gamma = 1.0 + 0.1 * jax.random.normal(k_g, (Cout,), dtype=jnp.float32)
    beta = 0.1 * jax.random.normal(k_be, (Cout,), dtype=jnp.float32)

    ref = block1_reference(x, w_conv, b_conv, gamma, beta)

    # 1) Fused small-problem fast path (single kernel, f32).
    out_fast = jax.block_until_ready(
        block1_forward(x, w_conv, b_conv, gamma, beta))
    assert out_fast.shape == (N, Cout, H, W)
    assert jnp.allclose(out_fast, ref, atol=2e-4, rtol=2e-4)

    # 2) General two-pass path (gram stats + apply), f32.
    out_2p = jax.block_until_ready(
        block1_forward(x, w_conv, b_conv, gamma, beta, force_two_pass=True))
    assert jnp.allclose(out_2p, ref, atol=2e-4, rtol=2e-4)

    # 3) bf16 HBM-traffic path (f32 accumulation), looser tolerance.
    out_bf16 = jax.block_until_ready(
        block1_forward(x, w_conv, b_conv, gamma, beta,
                       compute_dtype=jnp.bfloat16, out_dtype=jnp.bfloat16,
                       force_two_pass=True))
    assert jnp.allclose(out_bf16.astype(jnp.float32), ref, atol=6e-2, rtol=6e-2)

    # TODO(synk): BatchNorm2d's running_mean/running_var buffer updates (a
    # training-time side effect that does not affect the forward output) are
    # not materialized by this kernel.

    print("KERNEL_OK")
</pallas_src>

<mosaic_0001>
module attributes {stable_mosaic.version = 11 : i64} {
  func.func @_fused_small_kernel(%arg0: memref<2x4x256xf32, #tpu.memory_space<vmem>>, %arg1: memref<8x4xf32, #tpu.memory_space<vmem>>, %arg2: memref<8x1xf32, #tpu.memory_space<vmem>>, %arg3: memref<8x1xf32, #tpu.memory_space<vmem>>, %arg4: memref<2x8x256xf32, #tpu.memory_space<vmem>>, %arg5: memref<2x8x256xf32, #tpu.memory_space<vmem>>) attributes {dimension_semantics = [], scalar_prefetch = 0 : i64, scratch_operands = 1 : i64, tpu.core_type = #tpu.core_type<tc>} {
    %cst = arith.constant 0.000000e+00 : f32
    %0 = vector.broadcast %cst : f32 to vector<8x1xf32>
    %cst_0 = arith.constant 0.000000e+00 : f32
    %1 = vector.broadcast %cst_0 : f32 to vector<8x1xf32>
    %c0 = arith.constant 0 : index
    %c0_1 = arith.constant 0 : index
    %2 = vector.load %arg1[%c0, %c0_1] : memref<8x4xf32, #tpu.memory_space<vmem>>, vector<8x4xf32>
    %c0_2 = arith.constant 0 : index
    %c0_3 = arith.constant 0 : index
    %c0_4 = arith.constant 0 : index
    %3 = vector.load %arg0[%c0_2, %c0_3, %c0_4] : memref<2x4x256xf32, #tpu.memory_space<vmem>>, vector<1x4x256xf32>
    %4 = vector.shape_cast %3 : vector<1x4x256xf32> to vector<4x256xf32>
    %cst_5 = arith.constant dense<0.000000e+00> : vector<8x256xf32>
    %5 = tpu.matmul %2, %4, %cst_5 {dimension_numbers = #tpu.dot_dimension_numbers<[1], [0], [0], [1], [0, 0, 1, 1], [], []>} : vector<8x4xf32>, vector<4x256xf32>, vector<8x256xf32> -> vector<8x256xf32>
    %c0_6 = arith.constant 0 : index
    %c0_7 = arith.constant 0 : index
    %c0_8 = arith.constant 0 : index
    %6 = vector.load %arg5[%c0_6, %c0_7, %c0_8] : memref<2x8x256xf32, #tpu.memory_space<vmem>>, vector<1x8x256xf32>
    %7 = vector.shape_cast %6 : vector<1x8x256xf32> to vector<8x256xf32>
    %8 = vector.shape_cast %5 : vector<8x256xf32> to vector<1x8x256xf32>
    tpu.vector_store %arg5[%c0_6, %c0_7, %c0_8], %8 {strides = array<i32>} : memref<2x8x256xf32, #tpu.memory_space<vmem>>, vector<1x8x256xf32>,
    %cst_9 = arith.constant dense<0.000000e+00> : vector<8xf32>
    %9 = vector.multi_reduction <add>, %5, %cst_9 [1] : vector<8x256xf32> to vector<8xf32>
    %10 = vector.shape_cast %9 : vector<8xf32> to vector<8x1xf32>
    %11 = arith.addf %0, %10 : vector<8x1xf32>
    %12 = arith.mulf %5, %5 : vector<8x256xf32>
    %cst_10 = arith.constant dense<0.000000e+00> : vector<8xf32>
    %13 = vector.multi_reduction <add>, %12, %cst_10 [1] : vector<8x256xf32> to vector<8xf32>
    %14 = vector.shape_cast %13 : vector<8xf32> to vector<8x1xf32>
    %15 = arith.addf %1, %14 : vector<8x1xf32>
    %c0_11 = arith.constant 0 : index
    %c0_12 = arith.constant 0 : index
    %16 = vector.load %arg1[%c0_11, %c0_12] : memref<8x4xf32, #tpu.memory_space<vmem>>, vector<8x4xf32>
    %c1 = arith.constant 1 : index
    %c0_13 = arith.constant 0 : index
    %c0_14 = arith.constant 0 : index
    %17 = vector.load %arg0[%c1, %c0_13, %c0_14] : memref<2x4x256xf32, #tpu.memory_space<vmem>>, vector<1x4x256xf32>
    %18 = vector.shape_cast %17 : vector<1x4x256xf32> to vector<4x256xf32>
    %cst_15 = arith.constant dense<0.000000e+00> : vector<8x256xf32>
    %19 = tpu.matmul %16, %18, %cst_15 {dimension_numbers = #tpu.dot_dimension_numbers<[1], [0], [0], [1], [0, 0, 1, 1], [], []>} : vector<8x4xf32>, vector<4x256xf32>, vector<8x256xf32> -> vector<8x256xf32>
    %c1_16 = arith.constant 1 : index
    %c0_17 = arith.constant 0 : index
    %c0_18 = arith.constant 0 : index
    %20 = vector.load %arg5[%c1_16, %c0_17, %c0_18] : memref<2x8x256xf32, #tpu.memory_space<vmem>>, vector<1x8x256xf32>
    %21 = vector.shape_cast %20 : vector<1x8x256xf32> to vector<8x256xf32>
    %22 = vector.shape_cast %19 : vector<8x256xf32> to vector<1x8x256xf32>
    tpu.vector_store %arg5[%c1_16, %c0_17, %c0_18], %22 {strides = array<i32>} : memref<2x8x256xf32, #tpu.memory_space<vmem>>, vector<1x8x256xf32>,
    %cst_19 = arith.constant dense<0.000000e+00> : vector<8xf32>
    %23 = vector.multi_reduction <add>, %19, %cst_19 [1] : vector<8x256xf32> to vector<8xf32>
    %24 = vector.shape_cast %23 : vector<8xf32> to vector<8x1xf32>
    %25 = arith.addf %11, %24 : vector<8x1xf32>
    %26 = arith.mulf %19, %19 : vector<8x256xf32>
    %cst_20 = arith.constant dense<0.000000e+00> : vector<8xf32>
    %27 = vector.multi_reduction <add>, %26, %cst_20 [1] : vector<8x256xf32> to vector<8xf32>
    %28 = vector.shape_cast %27 : vector<8xf32> to vector<8x1xf32>
    %29 = arith.addf %15, %28 : vector<8x1xf32>
    %cst_21 = arith.constant 0.001953125 : f32
    %30 = vector.broadcast %cst_21 : f32 to vector<8x1xf32>
    %31 = arith.mulf %25, %30 : vector<8x1xf32>
    %cst_22 = arith.constant 0.001953125 : f32
    %32 = vector.broadcast %cst_22 : f32 to vector<8x1xf32>
    %33 = arith.mulf %29, %32 : vector<8x1xf32>
    %34 = arith.mulf %31, %31 : vector<8x1xf32>
    %35 = arith.subf %33, %34 : vector<8x1xf32>
    %cst_23 = arith.constant 0.000000e+00 : f32
    %36 = vector.broadcast %cst_23 : f32 to vector<8x1xf32>
    %37 = arith.maximumf %35, %36 : vector<8x1xf32>
    %c0_24 = arith.constant 0 : index
    %c0_25 = arith.constant 0 : index
    %38 = vector.load %arg2[%c0_24, %c0_25] : memref<8x1xf32, #tpu.memory_space<vmem>>, vector<8x1xf32>
    %cst_26 = arith.constant 9.99999974E-6 : f32
    %39 = vector.broadcast %cst_26 : f32 to vector<8x1xf32>
    %40 = arith.addf %37, %39 : vector<8x1xf32>
    %41 = math.rsqrt %40 : vector<8x1xf32>
    %42 = arith.mulf %38, %41 : vector<8x1xf32>
    %c0_27 = arith.constant 0 : index
    %c0_28 = arith.constant 0 : index
    %43 = vector.load %arg3[%c0_27, %c0_28] : memref<8x1xf32, #tpu.memory_space<vmem>>, vector<8x1xf32>
    %44 = arith.mulf %31, %42 : vector<8x1xf32>
    %45 = arith.subf %43, %44 : vector<8x1xf32>
    %c0_29 = arith.constant 0 : index
    %c0_30 = arith.constant 0 : index
    %c0_31 = arith.constant 0 : index
    %46 = vector.load %arg5[%c0_29, %c0_30, %c0_31] : memref<2x8x256xf32, #tpu.memory_space<vmem>>, vector<1x8x256xf32>
    %47 = vector.shape_cast %46 : vector<1x8x256xf32> to vector<8x256xf32>
    %48 = vector.broadcast %42 : vector<8x1xf32> to vector<8x256xf32>
    %49 = arith.mulf %48, %47 : vector<8x256xf32>
    %50 = vector.broadcast %45 : vector<8x1xf32> to vector<8x256xf32>
    %51 = arith.addf %49, %50 : vector<8x256xf32>
    %cst_32 = arith.constant 0.000000e+00 : f32
    %52 = vector.broadcast %cst_32 : f32 to vector<8x256xf32>
    %53 = arith.maximumf %51, %52 : vector<8x256xf32>
    %c0_33 = arith.constant 0 : index
    %c0_34 = arith.constant 0 : index
    %c0_35 = arith.constant 0 : index
    %54 = vector.load %arg4[%c0_33, %c0_34, %c0_35] : memref<2x8x256xf32, #tpu.memory_space<vmem>>, vector<1x8x256xf32>
    %55 = vector.shape_cast %54 : vector<1x8x256xf32> to vector<8x256xf32>
    %56 = vector.shape_cast %53 : vector<8x256xf32> to vector<1x8x256xf32>
    tpu.vector_store %arg4[%c0_33, %c0_34, %c0_35], %56 {strides = array<i32>} : memref<2x8x256xf32, #tpu.memory_space<vmem>>, vector<1x8x256xf32>,
    %c1_36 = arith.constant 1 : index
    %c0_37 = arith.constant 0 : index
    %c0_38 = arith.constant 0 : index
    %57 = vector.load %arg5[%c1_36, %c0_37, %c0_38] : memref<2x8x256xf32, #tpu.memory_space<vmem>>, vector<1x8x256xf32>
    %58 = vector.shape_cast %57 : vector<1x8x256xf32> to vector<8x256xf32>
    %59 = vector.broadcast %42 : vector<8x1xf32> to vector<8x256xf32>
    %60 = arith.mulf %59, %58 : vector<8x256xf32>
    %61 = vector.broadcast %45 : vector<8x1xf32> to vector<8x256xf32>
    %62 = arith.addf %60, %61 : vector<8x256xf32>
    %cst_39 = arith.constant 0.000000e+00 : f32
    %63 = vector.broadcast %cst_39 : f32 to vector<8x256xf32>
    %64 = arith.maximumf %62, %63 : vector<8x256xf32>
    %c1_40 = arith.constant 1 : index
    %c0_41 = arith.constant 0 : index
    %c0_42 = arith.constant 0 : index
    %65 = vector.load %arg4[%c1_40, %c0_41, %c0_42] : memref<2x8x256xf32, #tpu.memory_space<vmem>>, vector<1x8x256xf32>
    %66 = vector.shape_cast %65 : vector<1x8x256xf32> to vector<8x256xf32>
    %67 = vector.shape_cast %64 : vector<8x256xf32> to vector<1x8x256xf32>
    tpu.vector_store %arg4[%c1_40, %c0_41, %c0_42], %67 {strides = array<i32>} : memref<2x8x256xf32, #tpu.memory_space<vmem>>, vector<1x8x256xf32>,
    return
  }
}

</mosaic_0001>

<bundles_post_ra>
// kernel: tpu_custom_call.1
= control target key start
LH: loop header
LB: loop body
LE: loop exit
PB: predicated region body
PF: predicated region fallthrough
CT: control target
= control target key end

     0   :  { %vm26_vm0 = vcmask 1043456   ;;  %v311_v3 = vmov 0.0   ;;  %s368_s0 = inlined_call_operand.vmem [shape: f32[2,4,256], index: 0, kind: input, shape index: {}]   ;;  %s369_s1 = inlined_call_operand.vmem [shape: f32[8,4], index: 1, kind: input, shape index: {}]   ;;  %s370_s2 = inlined_call_operand.vmem [shape: f32[8,1], index: 2, kind: input, shape index: {}]   ;;  %s371_s3 = inlined_call_operand.vmem [shape: f32[8,1], index: 3, kind: input, shape index: {}]   ;;  %s372_s4 = inlined_call_operand.hbm [shape: f32[2,8,256], index: 4, kind: output, shape index: {}]  }
   0x1   :  { %v19_v0 = vld [vmem:[%s368_s0] sm:$0xff]  ;;  %v272_v1 = vld [vmem:[%s368_s0 + $0x8] sm:$0xff]  ;;  %95 = vmatprep.mubr.f32.mxu0 %v311_v3  ;;  %190 = vmatprep.mubr.f32.mxu1 %v311_v3 }
   0x2   :  { %v21_v2 = vcombine.high %v19_v0, %v19_v0  ;;  %v118_v4 = vcombine.high %v272_v1, %v272_v1 }
   0x3   :  { %9 = vsyncpa [#allocation4], 0  ;;  %v18_v5 = vld [vmem:[%s369_s1] sm:$0xff]  ;;  %vm22_vm1 = vcmask 31744   ;;  %v312_v18 = vmov 0   ;;  %s313_s23 = smov [#allocation3]  }
   0x4   :  { %269 = vmatprep.subr.msk.mxu0 %vm26_vm0, %v21_v2  ;;  %273 = vmatprep.subr.msk.mxu1 %vm26_vm0, %v118_v4  ;;  %v215_v31 = vld [vmem:[%s370_s2] sm:$0xff]  ;;  %s258_s24 = sshll.u32 %s313_s23, 4  ;;  %s259_s24 = int_to_ptr.vmem [resolvable:$true] %s258_s24 }
   0x5   :  { %270 = vmatpush1.msk.msra.mxu0 %vm26_vm0, %v19_v0  ;;  %274 = vmatpush1.msk.msra.mxu1 %vm26_vm0, %v272_v1  ;;  %v219_v34 = vld [vmem:[%s371_s3] sm:$0xff]  ;;  %s287_s2 = scalar_lea.vmem %s259_s24, 512  ;;  %p292_p1 = scmp.lt.s32.totalorder %s259_s24, %s259_s24 }
   0x6   :  { %271 = vmatmul.mubr.msk.f32.vlgmr.msra.gmra.mrb[0].mxu0 %vm22_vm1, %v18_v5  ;;  %275 = vmatmul.mubr.msk.f32.vlgmr.msra.gmra.mrb[0].mxu1 %vm22_vm1, %v18_v5  ;;  %p288_p0 = scmp.ne.s32.totalorder %s259_s24, %s287_s2  ;;  %p293_p2 = scmp.lt.s32.totalorder %s287_s2, %s287_s2 }
   0x7   :  { %281 = vset.pattern.permute.xlu0 %v312_v18  ;;  %282 = vset.pattern.permute.xlu1 %v312_v18 }
   0x8   :  { %p294_p3 = por %p293_p2, %p292_p1 }
   0xa   :  { %p295_p4 = pnand %p294_p3, %p288_p0 }
  0xd9   :  { %v97_v6 = vpop.f32.mrb[0].mxu0  ;;  %v192_v7 = vpop.f32.mrb[0].mxu1 }
  0xda   :  { %v99_v8 = vpop.f32.mrb[1].mxu0  ;;  %v194_v9 = vpop.f32.mrb[1].mxu1  ;;  %v108_v10 = vmul.f32 %v97_v6, %v97_v6  ;;  %v204_v11 = vmul.f32 %v192_v7, %v192_v7 }
  0xdb   :  { %v109_v12 = vmul.f32 %v99_v8, %v99_v8  ;;  %v205_v13 = vmul.f32 %v194_v9, %v194_v9  ;;  %v104_v14 = vadd.f32 %v99_v8, %v97_v6  ;;  %v200_v15 = vadd.f32 %v194_v9, %v192_v7 }
  0xdd   :  { %105 = vadd.xlane.f32.xlu0 %v104_v14  ;;  %v110_v16 = vadd.f32 %v109_v12, %v108_v10  ;;  %v206_v17 = vadd.f32 %v205_v13, %v204_v11 }
  0xdf   :  { %111 = vadd.xlane.f32.xlu1 %v110_v16 }
  0xe1   :  { %201 = vadd.xlane.f32.xlu0 %v200_v15 }
  0xe3   :  { %207 = vadd.xlane.f32.xlu1 %v206_v17 }
 0x16a   :  { %v106_v19 = vpop.xlane.xlu0 %105 }
 0x16c   :  { %v112_v20 = vpop.xlane.xlu1 %111 }
 0x16e   :  { %v202_v21 = vpop.xlane.xlu0 %201 }
 0x16f   :  { %v203_v22 = vadd.f32 %v202_v21, %v106_v19 }
 0x170   :  { %v208_v23 = vpop.xlane.xlu1 %207 }
 0x171   :  { %v210_v24 = vmul.f32 0.001953125, %v203_v22  ;;  %v209_v25 = vadd.f32 %v208_v23, %v112_v20 }
 0x173   :  { %v212_v26 = vmul.f32 %v210_v24, %v210_v24  ;;  %v211_v27 = vmul.f32 0.001953125, %v209_v25 }
 0x175   :  { %v213_v28 = vsub.f32 %v211_v27, %v212_v26 }
 0x177   :  { %v214_v29 = vmax.f32 %v213_v28, 0.0 }
 0x179   :  { %v216_v30 = vadd.f32 1e-05, %v214_v29 }
 0x17b   :  { %285 = vrsqrt.f32 %v216_v30 }
 0x185   :  { %v286_v32 = vpop.eup %285 }
 0x186   :  { %v218_v33 = vmul.f32 %v286_v32, %v215_v31 }
 0x188   :  { %226 = vperm.xlu0 %281, %v218_v33   ;;  %v220_v35 = vmul.f32 %v218_v33, %v210_v24 }
 0x18a   :  { %v221_v36 = vsub.f32 %v219_v34, %v220_v35 }
 0x18c   :  { %233 = vperm.xlu1 %282, %v221_v36  }
 0x207   :  { %v227_v37 = vpop.permute.xlu0 %226 }
 0x208   :  { %v229_v38 = vmul.f32 %v227_v37, %v97_v6  ;;  %v230_v39 = vmul.f32 %v227_v37, %v99_v8  ;;  %v244_v40 = vmul.f32 %v227_v37, %v192_v7  ;;  %v245_v41 = vmul.f32 %v227_v37, %v194_v9 }
 0x20b   :  { %v234_v42 = vpop.permute.xlu1 %233 }
 0x20c   :  { %v236_v43 = vadd.f32 %v234_v42, %v229_v38  ;;  %v237_v44 = vadd.f32 %v234_v42, %v230_v39  ;;  %v246_v45 = vadd.f32 %v244_v40, %v234_v42  ;;  %v247_v46 = vadd.f32 %v245_v41, %v234_v42 }
 0x20e   :  { %v238_v47 = vmax.f32 %v236_v43, 0.0  ;;  %v239_v48 = vmax.f32 %v237_v44, 0.0  ;;  %v248_v49 = vmax.f32 %v246_v45, 0.0  ;;  %v249_v50 = vmax.f32 %v247_v46, 0.0 }
 0x210   :  { %240 = vst [vmem:[#allocation3] sm:$0xff] %v238_v47  ;;  %241 = vst [vmem:[#allocation3 + $0x8] sm:$0xff] %v239_v48 }
 0x211   :  { %251 = vst [vmem:[#allocation3 + $0x10] sm:$0xff] %v248_v49  ;;  %252 = vst [vmem:[#allocation3 + $0x18] sm:$0xff] %v249_v50 }
 0x212   :  { %298 = shalt.err (!%p295_p4)
}
 0x213   :  { %s299_s26 = scalar_lea.hbm %s372_s4, 512 }
 0x214   :  { %p300_p5 = scmp.ne.s32.totalorder %s372_s4, %s299_s26  ;;  %p303_p6 = scmp.lt.u32.totalorder %s299_s26, %s372_s4 }
 0x216   :  { %p305_p7 = pnand %p303_p6, %p300_p5 }
 0x218   :  { %308 = shalt.err (!%p305_p7)
}
 0x219   :  { %s314_s5 = smov 256   ;;  %s315_s6 = smov 16  }
 0x21a   :  { %264 = dma.vmem_to_hbm [thread:$0]  %s259_s24, 512, %s372_s4, [#allocation4], %s314_s5, %s314_s5, %s315_s6  }
 0x21b   :  { %309 = dma.done.wait [#allocation4], 512  }
 0x21c   :  { %310 = vsyncadd [#allocation4], 4294966784 }
 0x21d   :  { %268 = vsyncpa [#allocation4], 1 }

</bundles_post_ra>
